<compile_context>
chip_gen: v7x
topology: tpu7x:2x2x1
jax: 0.10.0
libtpu: 0.0.40
codegen_flags: <defaults>
</compile_context>

<pallas_src>
import functools
import math

import jax
import jax.numpy as jnp
from jax.experimental import pallas as pl
from jax.experimental.pallas import tpu as pltpu


def _round_up(x, m):
    return (x + m - 1) // m * m


def _timestep_embed_kernel(t_ref, out_ref, *, half, log_max_period):
    """One row-tile of the embedding.

    t_ref:   (tile_n, 1)   float32 timesteps (column).
    out_ref: (tile_n, dim) float32; cols [0:half)=cos, [half:2*half)=sin,
             any leftover (odd dim) column is zero.

    All transcendentals (exp / cos / sin) run on the EUP; the per-lane
    frequency table is rebuilt from an iota so no constant is DMA'd in.
    """
    tile_n, out_dim = out_ref.shape

    col = jax.lax.broadcasted_iota(jnp.int32, (1, out_dim), 1)        # (1, dim)
    # frequency index: j for j < half, j - half for the sin half.
    k = jnp.where(col < half, col, col - half).astype(jnp.float32)
    # Same op order as the reference: ((-log(max_period)) * i) / half.
    freqs = jnp.exp((-log_max_period) * k / half)                     # (1, dim), EUP

    args = t_ref[...] * freqs                                         # (tile_n, dim)
    emb = jnp.where(col < half, jnp.cos(args), jnp.sin(args))         # cos/sin per lane
    if out_dim != 2 * half:                                           # odd dim -> zero pad col
        emb = jnp.where(col < 2 * half, emb, jnp.float32(0.0))

    out_ref[...] = emb                                                # single full-width store


def timestep_embedding(t, dim, max_period=10000):
    """JAX/Pallas equivalent of SD's `timestep_embedding(t, dim)`."""
    t = jnp.asarray(t, jnp.float32).reshape(-1)
    n = t.shape[0]
    half = dim // 2
    if half == 0:
        # dim == 1 (or 0): reference emits all-zero padding columns only.
        return jnp.zeros((n, dim), jnp.float32)

    # Row tiling: rows are a multiple of 8 (unmasked sublanes); cap the tile so
    # the double-buffered (tile_n, dim) f32 output stays ~<= 4 MiB per buffer,
    # comfortably inside v7x's 64 MiB VMEM / 32 MiB default scoped limit.
    rows_cap = max(8, ((4 * 1024 * 1024) // (4 * dim)) // 8 * 8)
    tile_n = int(min(1024, rows_cap, _round_up(n, 8)))
    n_pad = _round_up(n, tile_n)

    t_col = t.reshape(n, 1)
    if n_pad != n:
        t_col = jnp.pad(t_col, ((0, n_pad - n), (0, 0)))

    kernel = functools.partial(
        _timestep_embed_kernel, half=half, log_max_period=math.log(max_period)
    )

    emb = pl.pallas_call(
        kernel,
        out_shape=jax.ShapeDtypeStruct((n_pad, dim), jnp.float32),
        grid=(n_pad // tile_n,),
        in_specs=[pl.BlockSpec((tile_n, 1), lambda i: (i, 0))],
        out_specs=pl.BlockSpec((tile_n, dim), lambda i: (i, 0)),
        compiler_params=pltpu.CompilerParams(
            dimension_semantics=("parallel",),
        ),
        cost_estimate=pl.CostEstimate(
            flops=2 * n_pad * dim,
            transcendentals=3 * n_pad * dim,        # exp + cos + sin per element
            bytes_accessed=4 * n_pad * (dim + 1),   # t in + emb out
        ),
    )(t_col)

    if n_pad != n:
        emb = emb[:n]
    return emb


class Timestep:
    """Mirror of the (parameter-free) PyTorch nn.Module."""

    def __init__(self, dim):
        self.dim = dim

    def __call__(self, t):
        return timestep_embedding(t, self.dim)


def _reference(t, dim, max_period=10000):
    half = dim // 2
    freqs = jnp.exp(
        -math.log(max_period) * jnp.arange(half, dtype=jnp.float32) / half
    )
    args = t.astype(jnp.float32)[:, None] * freqs[None, :]
    emb = jnp.concatenate([jnp.cos(args), jnp.sin(args)], axis=-1)
    if dim % 2:
        emb = jnp.concatenate([emb, jnp.zeros_like(emb[:, :1])], axis=-1)
    return emb


if __name__ == "__main__":
    key = jax.random.PRNGKey(0)
    k0, k1 = jax.random.split(key)

    # Case 1: typical SD shapes — batch of 8 timesteps, 256-dim embedding.
    N, DIM = 8, 256
    t = jax.random.uniform(k0, (N,), dtype=jnp.float32, minval=0.0, maxval=1000.0)
    out = jax.block_until_ready(Timestep(DIM)(t))
    ref = _reference(t, DIM)
    assert out.shape == (N, DIM), out.shape
    assert out.dtype == jnp.float32, out.dtype
    # atol accounts for Mosaic-vs-XLA exp/cos/sin implementation deltas at
    # phase arguments up to ~1e3 rad (both paths are f32).
    assert jnp.allclose(out, ref, atol=2e-4, rtol=1e-5), "mismatch vs reference (case 1)"

    # Case 2: non-multiple-of-8 batch (exercises row padding) and smaller dim.
    N2, DIM2 = 5, 64
    t2 = jax.random.uniform(k1, (N2,), dtype=jnp.float32, minval=0.0, maxval=1000.0)
    out2 = jax.block_until_ready(Timestep(DIM2)(t2))
    ref2 = _reference(t2, DIM2)
    assert out2.shape == (N2, DIM2), out2.shape
    assert jnp.allclose(out2, ref2, atol=2e-4, rtol=1e-5), "mismatch vs reference (case 2)"

    print("KERNEL_OK")
</pallas_src>

<mosaic_0001>
module attributes {stable_mosaic.version = 11 : i64} {
  func.func @_timestep_embed_kernel(%arg0: i32, %arg1: memref<8x1xf32, #tpu.memory_space<vmem>>, %arg2: memref<8x256xf32, #tpu.memory_space<vmem>>) attributes {dimension_semantics = [#tpu.dimension_semantics<parallel>], iteration_bounds = array<i64: 1>, scalar_prefetch = 0 : i64, scratch_operands = 0 : i64, tpu.core_type = #tpu.core_type<tc>, window_params = [{transform_indices = @transform_0, window_bounds = array<i64: 8, 1>}, {transform_indices = @transform_1, window_bounds = array<i64: 8, 256>}]} {
    %0 = tpu.iota {dimensions = array<i32: 1>} : vector<1x256xi32>
    %c128_i32 = arith.constant 128 : i32
    %1 = vector.broadcast %c128_i32 : i32 to vector<1x256xi32>
    %2 = arith.cmpi slt, %0, %1 : vector<1x256xi32>
    %c128_i32_0 = arith.constant 128 : i32
    %3 = vector.broadcast %c128_i32_0 : i32 to vector<1x256xi32>
    %4 = arith.subi %0, %3 : vector<1x256xi32>
    %5 = arith.select %2, %0, %4 : vector<1x256xi1>, vector<1x256xi32>
    %6 = arith.sitofp %5 : vector<1x256xi32> to vector<1x256xf32>
    %cst = arith.constant -9.21034049 : f32
    %7 = vector.broadcast %cst : f32 to vector<1x256xf32>
    %8 = arith.mulf %7, %6 : vector<1x256xf32>
    %cst_1 = arith.constant 1.280000e+02 : f32
    %9 = vector.broadcast %cst_1 : f32 to vector<1x256xf32>
    %10 = arith.divf %8, %9 : vector<1x256xf32>
    %11 = math.exp %10 : vector<1x256xf32>
    %c0 = arith.constant 0 : index
    %c0_2 = arith.constant 0 : index
    %12 = vector.load %arg1[%c0, %c0_2] : memref<8x1xf32, #tpu.memory_space<vmem>>, vector<8x1xf32>
    %13 = vector.broadcast %12 : vector<8x1xf32> to vector<8x256xf32>
    %14 = vector.broadcast %11 : vector<1x256xf32> to vector<8x256xf32>
    %15 = arith.mulf %13, %14 : vector<8x256xf32>
    %c128_i32_3 = arith.constant 128 : i32
    %16 = vector.broadcast %c128_i32_3 : i32 to vector<1x256xi32>
    %17 = arith.cmpi slt, %0, %16 : vector<1x256xi32>
    %18 = math.cos %15 : vector<8x256xf32>
    %19 = math.sin %15 : vector<8x256xf32>
    %20 = vector.shape_cast %17 : vector<1x256xi1> to vector<1x256xi1>
    %21 = vector.broadcast %20 : vector<1x256xi1> to vector<8x256xi1>
    %22 = arith.select %21, %18, %19 : vector<8x256xi1>, vector<8x256xf32>
    %c0_4 = arith.constant 0 : index
    %c0_5 = arith.constant 0 : index
    %23 = vector.load %arg2[%c0_4, %c0_5] : memref<8x256xf32, #tpu.memory_space<vmem>>, vector<8x256xf32>
    tpu.vector_store %arg2[%c0_4, %c0_5], %22 {strides = array<i32>} : memref<8x256xf32, #tpu.memory_space<vmem>>, vector<8x256xf32>,
    return
  }
  func.func @transform_0(%arg0: i32) -> (i32, i32) {
    %c0_i32 = arith.constant 0 : i32
    %c0_i32_0 = arith.constant 0 : i32
    return %arg0, %c0_i32 : i32, i32
  }
  func.func @transform_1(%arg0: i32) -> (i32, i32) {
    %c0_i32 = arith.constant 0 : i32
    %c0_i32_0 = arith.constant 0 : i32
    return %arg0, %c0_i32 : i32, i32
  }
}

</mosaic_0001>

<bundles_post_ra>
// kernel: tpu_custom_call.1
= control target key start
LH: loop header
LB: loop body
LE: loop exit
PB: predicated region body
PF: predicated region fallthrough
CT: control target
= control target key end

     0   :  { %v532_v1 = vmov 0   ;;  %s586_s0 = inlined_call_operand.vmem [shape: f32[8,1], index: 0, kind: input, shape index: {}]   ;;  %s587_s1 = inlined_call_operand.hbm [shape: f32[8,256], index: 1, kind: output, shape index: {}]  }
   0x1   :  { %v28_v0 = vld [vmem:[%s586_s0] sm:$0xff]  ;;  %501 = vset.pattern.permute.xlu0 %v532_v1 }
   0x2   :  { %31 = vperm.xlu0 %501, %v28_v0  }
   0x3   :  { %6 = vsyncpa [#allocation3], 0  ;;  %v9_v2 = vlaneseq  ;;  %v533_v21 = vmov 683565275   ;;  %v534_v23 = vmov 2475754826  }
   0x4   :  { %v535_v26 = vmov 2131351028   ;;  %v536_v29 = vmov 2102212464   ;;  %v537_v32 = vmov 920167782  }
   0x5   :  { %v10_v3 = vand.u32 127, %v9_v2  ;;  %v538_v35 = vmov 1326507024   ;;  %s539_s0 = smov [#allocation2]  }
   0x6   :  { %s464_s8 = sshll.u32 %s539_s0, 4  ;;  %s465_s8 = int_to_ptr.vmem [resolvable:$true] %s464_s8 }
   0x7   :  { %v17_v4 = vcvt.s32.f32 %v10_v3  ;;  %s508_s9 = scalar_lea.vmem %s465_s8, 256  ;;  %p513_p1 = scmp.lt.s32.totalorder %s465_s8, %s465_s8 }
   0x8   :  { %p509_p0 = scmp.ne.s32.totalorder %s465_s8, %s508_s9  ;;  %p514_p2 = scmp.lt.s32.totalorder %s508_s9, %s508_s9 }
   0x9   :  { %v19_v5 = vmul.f32 -9.2103405, %v17_v4 }
   0xa   :  { %p515_p3 = por %p514_p2, %p513_p1 }
   0xb   :  { %v22_v6 = vmul.f32 0.0078125, %v19_v5 }
   0xc   :  { %p516_p4 = pnand %p515_p3, %p509_p0 }
   0xd   :  { %v24_v7 = vmul.f32 1.442695, %v22_v6 }
   0xf   :  { %502 = vpow2.f32 %v24_v7 }
  0x19   :  { %v503_v8 = vpop.eup %502 }
  0x81   :  { %v32_v9 = vpop.permute.xlu0 %31 }
  0x82   :  { %v553_v10 = vmul.f32 %v503_v8, %v32_v9 }
  0x84   :  { %v39_v11 = vand.u32 2139095040, %v553_v10  ;;  %v36_v15 = vand.u32 2147483647, %v553_v10  ;;  %vm38_vm7 = vcmp.lt.s32.totalorder %v553_v10, 0  ;;  %vm128_vm15 = vweird.f32 %v553_v10 }
  0x86   :  { %v40_v12 = vshrl.u32 %v39_v11, 23  ;;  %v43_v18 = vand.u32 8388607, %v36_v15  ;;  %vm37_vm8 = vcmp.le.f32.partialorder %v36_v15, 0.7853982 }
  0x88   :  { %v473_v13 = vadd.s32 4294967169, %v40_v12  ;;  %v44_v37 = vor.u32 8388608, %v43_v18 }
  0x8a   :  { %v46_v14 = vadd.s32 1, %v473_v13  ;;  %v84_v51 = vshll.u32 %v44_v37, 8 }
  0x8c   :  { %vm47_vm0 = vcmp.gt.s32.totalorder %v46_v14, 0 }
  0x8d   :  { %v48_v16 = vsel %vm47_vm0, %v46_v14, 0 }
  0x8e   :  { %v50_v17 = vand.u32 31, %v48_v16  ;;  %v49_v20 = vshrl.u32 %v48_v16, 5 }
  0x90   :  { %v51_v19 = vsub.s32 32, %v50_v17  ;;  %v53_v22 = vshll.u32 %v533_v21, %v50_v17  ;;  %v56_v24 = vshll.u32 %v534_v23, %v50_v17  ;;  %v59_v28 = vshll.u32 %v535_v26, %v50_v17 }
  0x91   :  { %v62_v31 = vshll.u32 %v536_v29, %v50_v17  ;;  %v65_v34 = vshll.u32 %v537_v32, %v50_v17  ;;  %vm68_vm1 = vcmp.lt.s32.totalorder %v49_v20, 1  ;;  %vm71_vm2 = vcmp.lt.s32.totalorder %v49_v20, 4 }
  0x92   :  { %v54_v25 = vshrl.u32 %v534_v23, %v51_v19  ;;  %v57_v27 = vshrl.u32 %v535_v26, %v51_v19  ;;  %v60_v30 = vshrl.u32 %v536_v29, %v51_v19  ;;  %v63_v33 = vshrl.u32 %v537_v32, %v51_v19 }
  0x93   :  { %v66_v36 = vshrl.u32 %v538_v35, %v51_v19  ;;  %v52_v46 = vshrl.u32 %v533_v21, %v51_v19  ;;  %vm70_vm3 = vcmp.lt.s32.totalorder %v49_v20, 3  ;;  %vm69_vm4 = vcmp.lt.s32.totalorder %v49_v20, 2 }
  0x94   :  { %v55_v38 = vor.u32 %v54_v25, %v53_v22  ;;  %v58_v39 = vor.u32 %v57_v27, %v56_v24  ;;  %v61_v40 = vor.u32 %v60_v30, %v59_v28  ;;  %v64_v41 = vor.u32 %v63_v33, %v62_v31 }
  0x95   :  { %v67_v42 = vor.u32 %v66_v36, %v65_v34 }
  0x96   :  { %v73_v43 = vsel %vm71_vm2, %v61_v40, 2102212464  ;;  %v76_v44 = vsel %vm68_vm1, %v55_v38, %v58_v39  ;;  %v80_v45 = vsel %vm68_vm1, %v58_v39, %v61_v40  ;;  %v77_v47 = vsel %vm71_vm2, %v64_v41, 920167782 }
  0x97   :  { %v81_v48 = vsel %vm71_vm2, %v67_v42, 1326507024  ;;  %v78_v49 = vsel %vm70_vm3, %v61_v40, %v77_v47  ;;  %v72_v52 = vsel %vm68_vm1, %v52_v46, %v55_v38  ;;  %v74_v53 = vsel %vm70_vm3, %v58_v39, %v73_v43 }
  0x98   :  { %v82_v50 = vsel %vm70_vm3, %v64_v41, %v81_v48  ;;  %v79_v54 = vsel %vm69_vm4, %v76_v44, %v78_v49  ;;  %v75_v60 = vsel %vm69_vm4, %v72_v52, %v74_v53 }
  0x99   :  { %v83_v55 = vsel %vm69_vm4, %v80_v45, %v82_v50  ;;  %v562_v58 = vmul.u32.u64.low %v84_v51, %v79_v54  ;;  %v563_v59 = vmul.u32.u64.high %v84_v51, %v79_v54, %v562_v58  ;;  %v91_v62 = vmul.u32 %v84_v51, %v75_v60 }
  0x9a   :  { %v559_v56 = vmul.u32.u64.low %v84_v51, %v83_v55  ;;  %v560_v57 = vmul.u32.u64.high %v84_v51, %v83_v55, %v559_v56 }
  0x9b   :  { %v94_v61 = vadd.s32 1, %v563_v59 }
  0x9c   :  { %vm93_vm5 = vc.u32 %v560_v57, %v562_v58  ;;  %v92_v11 = vadd.s32 %v562_v58, %v560_v57 }
  0x9d   :  { %v95_v63 = vsel %vm93_vm5, %v94_v61, %v563_v59 }
  0x9e   :  { %v96_v0 = vadd.s32 %v95_v63, %v91_v62 }
  0xa0   :  { %v97_v1 = vadd.s32 536870912, %v96_v0 }
  0xa2   :  { %v98_v2 = vshrl.u32 %v97_v1, 30 }
  0xa4   :  { %v99_v3 = vshll.u32 %v98_v2, 30  ;;  %v122_v24 = vsub.s32 4, %v98_v2 }
  0xa6   :  { %v100_v4 = vsub.s32 %v96_v0, %v99_v3  ;;  %v123_v27 = vsel %vm38_vm7, %v122_v24, %v98_v2 }
  0xa7   :  { %v125_v29 = vsel %vm37_vm8, 0, %v123_v27 }
  0xa8   :  { %v102_v5 = vsub.s32 0, %v100_v4  ;;  %v439_v30 = vadd.s32 3, %v125_v29  ;;  %v129_v31 = vand.u32 3, %v125_v29 }
  0xaa   :  { %v474_v6 = vmin.u32 %v102_v5, %v100_v4  ;;  %v440_v32 = vand.u32 3, %v439_v30  ;;  %vm134_vm9 = vcmp.eq.s32.totalorder %v129_v31, 2  ;;  %vm131_vm11 = vcmp.eq.s32.totalorder %v129_v31, 0 }
  0xab   :  { %vm130_vm13 = vcmp.lt.s32.totalorder %v129_v31, 2 }
  0xac   :  { %v104_v7 = vclz %v474_v6  ;;  %vm445_vm10 = vcmp.eq.s32.totalorder %v440_v32, 2  ;;  %vm442_vm12 = vcmp.eq.s32.totalorder %v440_v32, 0  ;;  %vm441_vm14 = vcmp.lt.s32.totalorder %v440_v32, 2 }
  0xae   :  { %v475_v8 = vadd.s32 4294967294, %v104_v7 }
  0xb0   :  { %vm476_vm6 = vcmp.lt.s32.totalorder %v475_v8, 0 }
  0xb1   :  { %v107_v9 = vsel %vm476_vm6, 0, %v475_v8 }
  0xb2   :  { %v108_v12 = vsub.s32 32, %v107_v9  ;;  %v112_v13 = vsub.s32 4294967266, %v107_v9  ;;  %v109_v14 = vshll.u32 %v100_v4, %v107_v9 }
  0xb4   :  { %v110_v16 = vshrl.u32 %v92_v11, %v108_v12  ;;  %v113_v17 = vadd.s32 127, %v112_v13 }
  0xb6   :  { %v111_v18 = vor.u32 %v110_v16, %v109_v14  ;;  %v114_v19 = vshll.u32 %v113_v17, 23 }
  0xb8   :  { %v115_v20 = vor.u32 4788187, %v114_v19  ;;  %v118_v22 = vcvt.s32.f32 %v111_v18 }
  0xba   :  { %v116_v21 = vand.u32 2147483647, %v115_v20 }
  0xbc   :  { %v119_v23 = vmul.f32 %v118_v22, %v116_v21 }
  0xbe   :  { %v120_v25 = vxor.u32 2147483648, %v119_v23 }
  0xc0   :  { %v121_v26 = vsel %vm38_vm7, %v120_v25, %v119_v23 }
  0xc1   :  { %v124_v28 = vsel %vm37_vm8, %v553_v10, %v121_v26 }
  0xc2   :  { %504 = vcosq.f32 %v124_v28 }
  0xc3   :  { %506 = vsinq.f32 %v124_v28 }
  0xcc   :  { %v505_v33 = vpop.eup %504 }
  0xcd   :  { %v507_v34 = vpop.eup %506  ;;  %v135_v35 = vxor.u32 2147483648, %v505_v33 }
  0xce   :  { %v132_v36 = vxor.u32 2147483648, %v507_v34 }
  0xcf   :  { %v136_v15 = vsel %vm134_vm9, %v135_v35, %v507_v34  ;;  %v447_v37 = vsel %vm445_vm10, %v135_v35, %v507_v34 }
  0xd0   :  { %v133_v38 = vsel %vm131_vm11, %v505_v33, %v132_v36  ;;  %v444_v39 = vsel %vm442_vm12, %v505_v33, %v132_v36 }
  0xd1   :  { %v137_v40 = vsel %vm130_vm13, %v133_v38, %v136_v15  ;;  %v448_v41 = vsel %vm441_vm14, %v444_v39, %v447_v37 }
  0xd2   :  { %v138_v42 = vsel %vm128_vm15, nan, %v137_v40  ;;  %v449_v43 = vsel %vm128_vm15, nan, %v448_v41 }
  0xd3   :  { %456 = vst [vmem:[#allocation2] sm:$0xff] %v138_v42  ;;  %457 = vst [vmem:[#allocation2 + $0x8] sm:$0xff] %v449_v43 }
  0xd4   :  { %519 = shalt.err (!%p516_p4)
}
  0xd5   :  { %s520_s12 = scalar_lea.hbm %s587_s1, 256 }
  0xd6   :  { %p521_p5 = scmp.ne.s32.totalorder %s587_s1, %s520_s12  ;;  %p524_p6 = scmp.lt.u32.totalorder %s520_s12, %s587_s1 }
  0xd8   :  { %p526_p7 = pnand %p524_p6, %p521_p5 }
  0xda   :  { %529 = shalt.err (!%p526_p7)
}
  0xdb   :  { %467 = dma.vmem_to_hbm [thread:$0]  %s465_s8, 256, %s587_s1, [#allocation3]  }
  0xdc   :  { %530 = dma.done.wait [#allocation3], 256  }
  0xdd   :  { %531 = vsyncadd [#allocation3], 4294967040 }
  0xde   :  { %471 = vsyncpa [#allocation3], 1 }

</bundles_post_ra>
